<compile_context>
chip_gen: v6e
topology: v6e:2x2x1
jax: 0.10.0
libtpu: 0.0.40
codegen_flags: <defaults>
</compile_context>

<pallas_src>
import functools

import jax
import jax.numpy as jnp
from jax.experimental import pallas as pl
from jax.experimental.pallas import tpu as pltpu


def _label_smoothing_kernel(tgt_ref, pred_ref, loss_ref, *, smoothing,
                            ignore_index, num_classes):
    """Per-row smoothed-CE loss for one (tile_rows, C) block.

    Writes per-row losses (zeroed for ignore_index rows) to loss_ref.
    Normalization happens outside the kernel, so row blocks are independent
    and the grid axis can be 'parallel'.
    """
    pred = pred_ref[...].astype(jnp.float32)            # (TR, C)
    tgt = tgt_ref[...]                                  # (TR, 1) int32

    # Stable log-softmax pieces WITHOUT materializing logp.
    m = jnp.max(pred, axis=-1, keepdims=True)           # (TR, 1)
    shifted = pred - m                                  # (TR, C)
    lse = jnp.log(jnp.sum(jnp.exp(shifted), axis=-1, keepdims=True))  # (TR,1)

    sum_shifted = jnp.sum(shifted, axis=-1, keepdims=True)            # (TR,1)
    # Gather shifted[target] via iota comparison (no scatter/gather op).
    col = jax.lax.broadcasted_iota(jnp.int32, shifted.shape, 1)
    shifted_t = jnp.sum(jnp.where(col == tgt, shifted, 0.0),
                        axis=-1, keepdims=True)                       # (TR,1)

    logp_t = shifted_t - lse
    sum_logp = sum_shifted - jnp.float32(num_classes) * lse

    off_coef = smoothing / (num_classes - 1) if num_classes > 1 else 0.0
    row_loss = -((1.0 - smoothing) * logp_t + off_coef * (sum_logp - logp_t))

    # Zero rows whose target is the padding / ignore index.  This also covers
    # the rows added by padding N up to a multiple of tile_rows.
    row_loss = jnp.where(tgt == ignore_index, 0.0, row_loss)
    loss_ref[...] = row_loss


def _pick_tile_rows(n_rows, num_classes, itemsize):
    """Generation-aware row-tile size + VMEM limit.

    2 buffers x tile_rows x C x itemsize must fit comfortably inside the
    scoped VMEM limit (64 MiB physical on v7x, 128 MiB on v5e/v6e).
    """
    try:
        vmem_cap = int(pltpu.get_tpu_info().vmem_capacity_bytes)
    except Exception:
        vmem_cap = 64 * 1024 * 1024  # conservative: v7x per-TensorCore VMEM
    vmem_limit = int(0.75 * vmem_cap)

    # Double-buffered pred tiles get at most ~half the scoped limit; the rest
    # is headroom for the target / output blocks and compiler scratch.
    budget = vmem_limit // 2
    # Sublane packing: 8 rows for f32, 16 for bf16, 32 for int8.
    row_pack = max(8, 32 // max(itemsize, 1))
    tile_rows = (budget // (2 * num_classes * itemsize)) // row_pack * row_pack
    tile_rows = max(row_pack, min(tile_rows, 1024))
    # Never larger than the (row_pack-padded) row count.
    padded_n = -(-n_rows // row_pack) * row_pack
    tile_rows = min(tile_rows, padded_n)
    return tile_rows, vmem_limit


def label_smoothing_loss(pred, target, *, ignore_index, label_smoothing,
                         tile_rows=None):
    """Pallas-TPU forward of LabelSmoothingLoss.

    pred: [N, C] float (f32 / bf16 / ...), target: [N] int.
    Returns a scalar float32 loss.
    """
    n, c = pred.shape
    itemsize = jnp.dtype(pred.dtype).itemsize
    auto_tile, vmem_limit = _pick_tile_rows(n, c, itemsize)
    if tile_rows is None:
        tile_rows = auto_tile
    # TODO(synk): for very large vocab (C >= ~64K) add a class-tiled grid axis
    # with a streaming (online) log-sum-exp instead of one (tile_rows, C) block.

    # Denominators (computed from the ORIGINAL, unpadded target).
    if label_smoothing == 0.0:
        # F.cross_entropy(ignore_index=...) averages over non-ignored rows.
        denom = jnp.sum((target != ignore_index).astype(jnp.float32))
    else:
        # torch.mean over ALL rows (ignored rows contribute 0).
        denom = jnp.float32(n)

    # Pad rows so N is a multiple of tile_rows.  Padded rows get
    # target == ignore_index, so their loss is exactly zero and the divisor
    # above (original N) keeps torch.mean semantics.
    padded_n = -(-n // tile_rows) * tile_rows
    if padded_n != n:
        pred = jnp.pad(pred, ((0, padded_n - n), (0, 0)))
        target = jnp.pad(target, (0, padded_n - n),
                         constant_values=ignore_index)

    tgt2d = target.astype(jnp.int32).reshape(padded_n, 1)
    num_blocks = padded_n // tile_rows

    kernel = functools.partial(
        _label_smoothing_kernel,
        smoothing=float(label_smoothing),
        ignore_index=int(ignore_index),
        num_classes=c,
    )

    row_losses = pl.pallas_call(
        kernel,
        out_shape=jax.ShapeDtypeStruct((padded_n, 1), jnp.float32),
        grid_spec=pltpu.PrefetchScalarGridSpec(
            num_scalar_prefetch=0,
            grid=(num_blocks,),
            in_specs=[
                pl.BlockSpec((tile_rows, 1), lambda i: (i, 0)),   # target
                pl.BlockSpec((tile_rows, c), lambda i: (i, 0)),   # pred
            ],
            out_specs=pl.BlockSpec((tile_rows, 1), lambda i: (i, 0)),
        ),
        compiler_params=pltpu.CompilerParams(
            dimension_semantics=("parallel",),
            vmem_limit_bytes=vmem_limit,
        ),
    )(tgt2d, pred)

    return jnp.sum(row_losses) / denom


def _reference_loss(pred, target, ignore_index, smoothing):
    """Pure-JAX reference matching the PyTorch module."""
    pred = pred.astype(jnp.float32)
    _, c = pred.shape
    logp = jax.nn.log_softmax(pred, axis=-1)
    if smoothing == 0.0:
        logp_t = jnp.take_along_axis(
            logp, target.astype(jnp.int32)[:, None], axis=-1)[:, 0]
        valid = target != ignore_index
        return jnp.sum(jnp.where(valid, -logp_t, 0.0)) / jnp.sum(
            valid.astype(jnp.float32))
    onehot = jax.nn.one_hot(target, c, dtype=jnp.float32)
    onehot = onehot * (1.0 - smoothing) + (1.0 - onehot) * smoothing / (c - 1)
    onehot = jnp.where((target == ignore_index)[:, None], 0.0, onehot)
    return jnp.mean(jnp.sum(-onehot * logp, axis=-1))


if __name__ == "__main__":
    key = jax.random.PRNGKey(0)
    k1, k2 = jax.random.split(key)

    ignore_index = 0
    label_smoothing = 0.1

    # Small deterministic shapes (tokens x classes).  N is intentionally NOT a
    # multiple of 8 to exercise the row-padding path.
    N, C = 19, 32
    pred = jax.random.normal(k1, (N, C), dtype=jnp.float32)
    target = jax.random.randint(k2, (N,), 0, C, dtype=jnp.int32)
    # force a couple of padded / ignored positions
    target = target.at[3].set(ignore_index).at[10].set(ignore_index)

    # 1) f32 input, label smoothing > 0.
    loss = jax.block_until_ready(label_smoothing_loss(
        pred, target, ignore_index=ignore_index,
        label_smoothing=label_smoothing))
    ref = _reference_loss(pred, target, ignore_index, label_smoothing)
    assert jnp.allclose(loss, ref, rtol=1e-5, atol=1e-5), (loss, ref)

    # 2) bf16 input (halves HBM read traffic; cast to f32 inside the kernel).
    pred_bf16 = pred.astype(jnp.bfloat16)
    loss_bf = jax.block_until_ready(label_smoothing_loss(
        pred_bf16, target, ignore_index=ignore_index,
        label_smoothing=label_smoothing))
    ref_bf = _reference_loss(pred_bf16, target, ignore_index, label_smoothing)
    assert jnp.allclose(loss_bf, ref_bf, rtol=1e-2, atol=1e-2), (loss_bf, ref_bf)

    # 3) smoothing == 0 path (plain cross-entropy with ignore_index).
    loss0 = jax.block_until_ready(label_smoothing_loss(
        pred, target, ignore_index=ignore_index, label_smoothing=0.0))
    ref0 = _reference_loss(pred, target, ignore_index, 0.0)
    assert jnp.allclose(loss0, ref0, rtol=1e-5, atol=1e-5), (loss0, ref0)

    print("KERNEL_OK")
</pallas_src>

<mosaic_0001>
module attributes {stable_mosaic.version = 11 : i64} {
  func.func @_label_smoothing_kernel(%arg0: i32, %arg1: memref<24x1xi32, #tpu.memory_space<vmem>>, %arg2: memref<24x32xf32, #tpu.memory_space<vmem>>, %arg3: memref<24x1xf32, #tpu.memory_space<vmem>>) attributes {dimension_semantics = [#tpu.dimension_semantics<parallel>], iteration_bounds = array<i64: 1>, scalar_prefetch = 0 : i64, scratch_operands = 0 : i64, tpu.core_type = #tpu.core_type<tc>, window_params = [{transform_indices = @transform_0, window_bounds = array<i64: 24, 1>}, {transform_indices = @transform_1, window_bounds = array<i64: 24, 32>}, {transform_indices = @transform_2, window_bounds = array<i64: 24, 1>}]} {
    %c0 = arith.constant 0 : index
    %c0_0 = arith.constant 0 : index
    %0 = vector.load %arg2[%c0, %c0_0] : memref<24x32xf32, #tpu.memory_space<vmem>>, vector<24x32xf32>
    %c0_1 = arith.constant 0 : index
    %c0_2 = arith.constant 0 : index
    %1 = vector.load %arg1[%c0_1, %c0_2] : memref<24x1xi32, #tpu.memory_space<vmem>>, vector<24x1xi32>
    %cst = arith.constant dense<0xFF800000> : vector<24xf32>
    %2 = vector.multi_reduction <maximumf>, %0, %cst [1] : vector<24x32xf32> to vector<24xf32>
    %3 = vector.shape_cast %2 : vector<24xf32> to vector<24x1xf32>
    %4 = vector.broadcast %3 : vector<24x1xf32> to vector<24x32xf32>
    %5 = arith.subf %0, %4 : vector<24x32xf32>
    %6 = math.exp %5 : vector<24x32xf32>
    %cst_3 = arith.constant dense<0.000000e+00> : vector<24xf32>
    %7 = vector.multi_reduction <add>, %6, %cst_3 [1] : vector<24x32xf32> to vector<24xf32>
    %8 = vector.shape_cast %7 : vector<24xf32> to vector<24x1xf32>
    %9 = math.log %8 : vector<24x1xf32>
    %cst_4 = arith.constant dense<0.000000e+00> : vector<24xf32>
    %10 = vector.multi_reduction <add>, %5, %cst_4 [1] : vector<24x32xf32> to vector<24xf32>
    %11 = vector.shape_cast %10 : vector<24xf32> to vector<24x1xf32>
    %12 = tpu.iota {dimensions = array<i32: 1>} : vector<24x32xi32>
    %13 = vector.broadcast %1 : vector<24x1xi32> to vector<24x32xi32>
    %14 = arith.cmpi eq, %12, %13 : vector<24x32xi32>
    %cst_5 = arith.constant 0.000000e+00 : f32
    %15 = vector.broadcast %cst_5 : f32 to vector<24x32xf32>
    %16 = arith.select %14, %5, %15 : vector<24x32xi1>, vector<24x32xf32>
    %cst_6 = arith.constant dense<0.000000e+00> : vector<24xf32>
    %17 = vector.multi_reduction <add>, %16, %cst_6 [1] : vector<24x32xf32> to vector<24xf32>
    %18 = vector.shape_cast %17 : vector<24xf32> to vector<24x1xf32>
    %19 = arith.subf %18, %9 : vector<24x1xf32>
    %cst_7 = arith.constant 3.200000e+01 : f32
    %20 = vector.broadcast %cst_7 : f32 to vector<24x1xf32>
    %21 = arith.mulf %20, %9 : vector<24x1xf32>
    %22 = arith.subf %11, %21 : vector<24x1xf32>
    %cst_8 = arith.constant 0.899999976 : f32
    %23 = vector.broadcast %cst_8 : f32 to vector<24x1xf32>
    %24 = arith.mulf %23, %19 : vector<24x1xf32>
    %25 = arith.subf %22, %19 : vector<24x1xf32>
    %cst_9 = arith.constant 0.0032258064 : f32
    %26 = vector.broadcast %cst_9 : f32 to vector<24x1xf32>
    %27 = arith.mulf %26, %25 : vector<24x1xf32>
    %28 = arith.addf %24, %27 : vector<24x1xf32>
    %cst_10 = arith.constant 0.000000e+00 : f32
    %29 = vector.broadcast %cst_10 : f32 to vector<24x1xf32>
    %30 = arith.subf %29, %28 : vector<24x1xf32>
    %c0_i32 = arith.constant 0 : i32
    %31 = vector.broadcast %c0_i32 : i32 to vector<24x1xi32>
    %32 = arith.cmpi eq, %1, %31 : vector<24x1xi32>
    %cst_11 = arith.constant 0.000000e+00 : f32
    %33 = vector.broadcast %cst_11 : f32 to vector<24x1xf32>
    %34 = arith.select %32, %33, %30 : vector<24x1xi1>, vector<24x1xf32>
    %c0_12 = arith.constant 0 : index
    %c0_13 = arith.constant 0 : index
    %35 = vector.load %arg3[%c0_12, %c0_13] : memref<24x1xf32, #tpu.memory_space<vmem>>, vector<24x1xf32>
    tpu.vector_store %arg3[%c0_12, %c0_13], %34 {strides = array<i32>} : memref<24x1xf32, #tpu.memory_space<vmem>>, vector<24x1xf32>,
    return
  }
  func.func @transform_0(%arg0: i32) -> (i32, i32) {
    %c0_i32 = arith.constant 0 : i32
    %c0_i32_0 = arith.constant 0 : i32
    return %arg0, %c0_i32 : i32, i32
  }
  func.func @transform_1(%arg0: i32) -> (i32, i32) {
    %c0_i32 = arith.constant 0 : i32
    %c0_i32_0 = arith.constant 0 : i32
    return %arg0, %c0_i32 : i32, i32
  }
  func.func @transform_2(%arg0: i32) -> (i32, i32) {
    %c0_i32 = arith.constant 0 : i32
    %c0_i32_0 = arith.constant 0 : i32
    return %arg0, %c0_i32 : i32, i32
  }
}

</mosaic_0001>

<bundles_post_ra>
// kernel: tpu_custom_call.1
= control target key start
LH: loop header
LB: loop body
LE: loop exit
PB: predicated region body
PF: predicated region fallthrough
CT: control target
= control target key end

     0   :  { %vm17_vm0 = vcmask 261120   ;;  %v139_v3 = vmov 0   ;;  %v60_v20 = vlaneseq  ;;  %vm116_vm5 = vcmask 7168   ;;  %s209_s1 = inlined_call_operand.vmem [shape: f32[24,32], index: 1, kind: input, shape index: {}]   ;;  %s210_s0 = inlined_call_operand.vmem [shape: s32[24,1], index: 0, kind: input, shape index: {}]   ;;  %s211_s2 = inlined_call_operand.vmem [shape: f32[24,1], index: 2, kind: output, shape index: {}]  }
   0x1   :  { %v13_v0 = vld [vmem:[%s209_s1 + $0x10] sm:$0xff]  ;;  %v11_v1 = vld [vmem:[%s209_s1] sm:$0xff]  ;;  %v12_v2 = vld [vmem:[%s209_s1 + $0x8] sm:$0xff]  ;;  %125 = vset.pattern.permute.xlu1 %v139_v3  ;;  %126 = vset.pattern.permute.xlu0 %v139_v3 }
   0x2   :  { %v24_v4 = vsel %vm17_vm0, %v13_v0, -inf  ;;  %v18_v5 = vsel %vm17_vm0, %v11_v1, -inf  ;;  %v21_v6 = vsel %vm17_vm0, %v12_v2, -inf  ;;  %v170_v7 = vld [vmem:[%s210_s0] sm:$0xff]  ;;  %v176_v8 = vld [vmem:[%s210_s0 + $0x10] sm:$0xff]  ;;  %v182_v9 = vld [vmem:[%s210_s0 + $0x8] sm:$0xff] }
   0x3   :  { %25 = vmax.xlane.f32.xlu1 %v24_v4  ;;  %19 = vmax.xlane.f32.xlu0 %v18_v5  ;;  %v61_v24 = vand.u32 127, %v60_v20  ;;  %vm110_vm4 = vcmp.eq.s32.totalorder %v170_v7, 0  ;;  %vm112_vm6 = vcmp.eq.s32.totalorder %v176_v8, 0  ;;  %vm111_vm7 = vcmp.eq.s32.totalorder %v182_v9, 0 }
   0x7   :  { %22 = vmax.xlane.f32.xlu0 %v21_v6 }
  0x14   :  { %63 = vperm.xlu1 %125, %v170_v7  }
  0x18   :  { %69 = vperm.xlu1 %125, %v176_v8  }
  0x1d   :  { %66 = vperm.xlu0 %126, %v182_v9  }
  0x8c   :  { %v26_v10 = vpop.xlane.xlu1 %25  ;;  %v20_v11 = vpop.xlane.xlu0 %19 }
  0x8d   :  { %v29_v12 = vsub.f32 %v13_v0, %v26_v10  ;;  %v27_v13 = vsub.f32 %v11_v1, %v20_v11 }
  0x8f   :  { %v34_v14 = vmul.f32 1.442695, %v29_v12  ;;  %v30_v15 = vmul.f32 1.442695, %v27_v13  ;;  %v51_v31 = vsel %vm17_vm0, %v27_v13, 0.0  ;;  %v57_v34 = vsel %vm17_vm0, %v29_v12, 0.0 }
  0x90   :  { %v23_v16 = vpop.xlane.xlu0 %22  ;;  %v64_v19 = vpop.permute.xlu1 %63 }
  0x91   :  { %127 = vpow2.f32 %v34_v14  ;;  %v28_v17 = vsub.f32 %v12_v2, %v23_v16  ;;  %vm71_vm2 = vcmp.eq.s32.totalorder %v61_v24, %v64_v19 }
  0x92   :  { %129 = vpow2.f32 %v30_v15  ;;  %v74_v35 = vsel %vm71_vm2, %v27_v13, 0.0 }
  0x93   :  { %v32_v18 = vmul.f32 1.442695, %v28_v17  ;;  %v54_v32 = vsel %vm17_vm0, %v28_v17, 0.0  ;;  %v77_v36 = vsel %vm17_vm0, %v74_v35, 0.0 }
  0x94   :  { %v70_v22 = vpop.permute.xlu1 %69 }
  0x95   :  { %131 = vpow2.f32 %v32_v18  ;;  %vm73_vm1 = vcmp.eq.s32.totalorder %v61_v24, %v70_v22 }
  0x96   :  { %v76_v29 = vsel %vm73_vm1, %v29_v12, 0.0 }
  0x97   :  { %v83_v30 = vsel %vm17_vm0, %v76_v29, 0.0 }
  0x98   :  { %v67_v33 = vpop.permute.xlu0 %66 }
  0x99   :  { %vm72_vm3 = vcmp.eq.s32.totalorder %v61_v24, %v67_v33 }
  0x9a   :  { %v75_v37 = vsel %vm72_vm3, %v28_v17, 0.0 }
  0x9b   :  { %v80_v38 = vsel %vm17_vm0, %v75_v37, 0.0 }
  0x9e   :  { %v128_v21 = vpop.eup %127 }
  0x9f   :  { %v130_v23 = vpop.eup %129  ;;  %v42_v27 = vsel %vm17_vm0, %v128_v21, 0.0 }
  0xa0   :  { %v36_v25 = vsel %vm17_vm0, %v130_v23, 0.0 }
  0xa1   :  { %37 = vadd.xlane.f32.xlu1 %v36_v25 }
  0xa2   :  { %v132_v26 = vpop.eup %131 }
  0xa3   :  { %v39_v28 = vsel %vm17_vm0, %v132_v26, 0.0 }
  0xa4   :  { %40 = vadd.xlane.f32.xlu0 %v39_v28 }
  0xa5   :  { %43 = vadd.xlane.f32.xlu1 %v42_v27 }
  0xa8   :  { %84 = vadd.xlane.f32.xlu0 %v83_v30 }
  0xa9   :  { %52 = vadd.xlane.f32.xlu1 %v51_v31 }
  0xad   :  { %55 = vadd.xlane.f32.xlu1 %v54_v32 }
  0xb1   :  { %58 = vadd.xlane.f32.xlu1 %v57_v34 }
  0xb5   :  { %78 = vadd.xlane.f32.xlu1 %v77_v36 }
  0xb9   :  { %81 = vadd.xlane.f32.xlu1 %v80_v38 }
 0x12a   :  { %v38_v39 = vpop.xlane.xlu1 %37 }
 0x12b   :  { %133 = vlog2.f32 %v38_v39 }
 0x12d   :  { %v41_v40 = vpop.xlane.xlu0 %40 }
 0x12e   :  { %135 = vlog2.f32 %v41_v40  ;;  %v44_v41 = vpop.xlane.xlu1 %43 }
 0x12f   :  { %137 = vlog2.f32 %v44_v41 }
 0x131   :  { %v85_v57 = vpop.xlane.xlu0 %84 }
 0x132   :  { %v53_v42 = vpop.xlane.xlu1 %52 }
 0x136   :  { %v56_v43 = vpop.xlane.xlu1 %55 }
 0x138   :  { %v134_v44 = vpop.eup %133 }
 0x139   :  { %v46_v45 = vmul.f32 0.6931472, %v134_v44 }
 0x13a   :  { %v59_v46 = vpop.xlane.xlu1 %58 }
 0x13b   :  { %v136_v47 = vpop.eup %135  ;;  %v89_v48 = vmul.f32 32.0, %v46_v45 }
 0x13c   :  { %v138_v49 = vpop.eup %137  ;;  %v48_v50 = vmul.f32 0.6931472, %v136_v47 }
 0x13d   :  { %v50_v51 = vmul.f32 0.6931472, %v138_v49  ;;  %v92_v54 = vsub.f32 %v53_v42, %v89_v48 }
 0x13e   :  { %v90_v52 = vmul.f32 32.0, %v48_v50  ;;  %v79_v53 = vpop.xlane.xlu1 %78 }
 0x13f   :  { %v91_v55 = vmul.f32 32.0, %v50_v51  ;;  %v86_v56 = vsub.f32 %v79_v53, %v46_v45  ;;  %v88_v58 = vsub.f32 %v85_v57, %v50_v51 }
 0x140   :  { %v93_v61 = vsub.f32 %v56_v43, %v90_v52 }
 0x141   :  { %v94_v59 = vsub.f32 %v59_v46, %v91_v55  ;;  %v98_v60 = vsub.f32 %v92_v54, %v86_v56  ;;  %v95_v0 = vmul.f32 0.9, %v86_v56  ;;  %v97_v3 = vmul.f32 0.9, %v88_v58 }
 0x142   :  { %v82_v62 = vpop.xlane.xlu1 %81 }
 0x143   :  { %v100_v63 = vsub.f32 %v94_v59, %v88_v58  ;;  %v101_v1 = vmul.f32 0.0032258064, %v98_v60  ;;  %v87_v2 = vsub.f32 %v82_v62, %v48_v50 }
 0x145   :  { %v103_v4 = vmul.f32 0.0032258064, %v100_v63  ;;  %v104_v5 = vadd.f32 %v101_v1, %v95_v0  ;;  %v99_v6 = vsub.f32 %v93_v61, %v87_v2  ;;  %v96_v12 = vmul.f32 0.9, %v87_v2 }
 0x147   :  { %v106_v10 = vadd.f32 %v103_v4, %v97_v3  ;;  %v107_v11 = vsub.f32 0.0, %v104_v5  ;;  %v102_v13 = vmul.f32 0.0032258064, %v99_v6 }
 0x149   :  { %v109_v14 = vsub.f32 0.0, %v106_v10  ;;  %v113_v15 = vsel %vm110_vm4, 0.0, %v107_v11  ;;  %v105_v16 = vadd.f32 %v102_v13, %v96_v12 }
 0x14a   :  { %117 = vst.msk [vmem:[%s211_s2] sm:$0xff] %vm116_vm5, %v113_v15 }
 0x14b   :  { %v115_v17 = vsel %vm112_vm6, 0.0, %v109_v14  ;;  %v108_v18 = vsub.f32 0.0, %v105_v16 }
 0x14c   :  { %119 = vst.msk [vmem:[%s211_s2 + $0x10] sm:$0xff] %vm116_vm5, %v115_v17 }
 0x14d   :  { %v114_v7 = vsel %vm111_vm7, 0.0, %v108_v18 }
 0x14e   :  { %118 = vst.msk [vmem:[%s211_s2 + $0x8] sm:$0xff] %vm116_vm5, %v114_v7 }

</bundles_post_ra>
